<compile_context>
chip_gen: v7x
topology: tpu7x:2x2x1
jax: 0.10.0
libtpu: 0.0.40
codegen_flags: <defaults>
</compile_context>

<pallas_src>
import jax
import jax.numpy as jnp
from jax.experimental import pallas as pl
from jax.experimental.pallas import tpu as pltpu


_EPS = 1e-07
_NEG_LOGIT = -1e30  # sigmoid(_NEG_LOGIT) == 0.0 exactly in f32 (fits bf16 too)


def _round_up(x, m):
    return (x + m - 1) // m * m


def _soft_jaccard_kernel(out_ref, tgt_ref, loss_ref, inter_acc, union_acc):
    """Grid = (batch_tiles, class_tiles); class axis is the reduction axis."""
    k = pl.program_id(1)

    @pl.when(k == 0)
    def _():
        inter_acc[...] = jnp.zeros_like(inter_acc)
        union_acc[...] = jnp.zeros_like(union_acc)

    x = out_ref[...].astype(jnp.float32)          # (bt, ct) logits
    t = tgt_ref[...].astype(jnp.float32)          # (bt, ct) targets

    s = jax.nn.sigmoid(x)                         # EUP transcendental
    prod = s * t
    inter = jnp.sum(prod, axis=1, keepdims=True)                  # (bt, 1)
    union = (jnp.sum(s, axis=1, keepdims=True)
             + jnp.sum(t, axis=1, keepdims=True) - inter)         # (bt, 1)

    inter_acc[...] += inter
    union_acc[...] += union

    @pl.when(k == pl.num_programs(1) - 1)
    def _():
        # Padded batch rows have inter == union == 0 -> loss == 0 exactly.
        loss_ref[...] = 1.0 - (inter_acc[...] + _EPS) / (union_acc[...] + _EPS)


def soft_jaccard_loss(outputs, targets, *, batch_tile=None, c_tile=None):
    """outputs, targets: (B, C) float arrays (f32 or bf16). Returns scalar f32."""
    B, C = outputs.shape
    assert targets.shape == (B, C)
    itemsize = jnp.dtype(outputs.dtype).itemsize

    # ---- tile selection --------------------------------------------------
    C_pad = _round_up(C, 128)
    if c_tile is None:
        ct = min(C_pad, 4096)                     # cap lane extent; tile big C
    else:
        ct = min(_round_up(c_tile, 128), C_pad)
    C_pad = _round_up(C_pad, ct)

    if batch_tile is None:
        # ~2 MiB per input block (x2 inputs x2 pipeline buffers ~= 8 MiB),
        # comfortably inside the scoped VMEM of v5e/v6e/v7x.
        target_block_bytes = 2 << 20
        bt = max(16, (target_block_bytes // (ct * itemsize)) // 16 * 16)
    else:
        bt = max(16, _round_up(batch_tile, 16))   # multiple of 16 (bf16 packing)
    bt = min(bt, _round_up(B, 16))                # don't over-pad tiny batches
    B_pad = _round_up(B, bt)

    # ---- pad inputs --------------------------------------------------------
    # Padded logits -> sigmoid == 0, padded targets == 0: padded class lanes
    # add nothing to inter/union, padded batch rows get per-sample loss 0.
    if (B_pad, C_pad) != (B, C):
        pad = ((0, B_pad - B), (0, C_pad - C))
        outputs = jnp.pad(outputs, pad, constant_values=_NEG_LOGIT)
        targets = jnp.pad(targets, pad)

    grid = (B_pad // bt, C_pad // ct)

    # VMEM budget: 2 inputs x 2 pipeline buffers x block + output + scratch.
    block_bytes = bt * ct * itemsize
    vmem_needed = 4 * block_bytes + 8 * bt * 4 + (1 << 20)
    vmem_limit = int(min(100 << 20, max(32 << 20, vmem_needed)))

    cost = pl.CostEstimate(
        flops=6 * B_pad * C_pad,
        transcendentals=B_pad * C_pad,
        bytes_accessed=2 * B_pad * C_pad * itemsize + 4 * B_pad,
    )

    per_sample = pl.pallas_call(
        _soft_jaccard_kernel,
        out_shape=jax.ShapeDtypeStruct((B_pad, 1), jnp.float32),
        grid_spec=pltpu.PrefetchScalarGridSpec(
            num_scalar_prefetch=0,
            grid=grid,
            in_specs=[
                pl.BlockSpec((bt, ct), lambda i, k: (i, k)),
                pl.BlockSpec((bt, ct), lambda i, k: (i, k)),
            ],
            out_specs=pl.BlockSpec((bt, 1), lambda i, k: (i, 0)),
            scratch_shapes=[
                pltpu.VMEM((bt, 1), jnp.float32),   # inter accumulator
                pltpu.VMEM((bt, 1), jnp.float32),   # union accumulator
            ],
        ),
        compiler_params=pltpu.CompilerParams(
            dimension_semantics=("parallel", "arbitrary"),
            vmem_limit_bytes=vmem_limit,
        ),
        cost_estimate=cost,
    )(outputs, targets)

    # Padded rows contribute exactly 0; divide by the TRUE batch size.
    return jnp.sum(per_sample) / jnp.float32(B)


def _reference(outputs, targets):
    eps = 1e-07
    s = jax.nn.sigmoid(outputs.astype(jnp.float32))
    t = targets.astype(jnp.float32)
    inter = jnp.sum(s * t, axis=1)
    union = jnp.sum(s + t - s * t, axis=1)
    return jnp.mean(1.0 - (inter + eps) / (union + eps))


if __name__ == "__main__":
    key = jax.random.PRNGKey(0)

    # Case 1: AwA2-style multi-label head. Non-lane-aligned class count and
    # non-tile-aligned batch -> exercises both padding paths.
    B, C = 10, 85
    k1, k2, key = jax.random.split(key, 3)
    logits = jax.random.normal(k1, (B, C), dtype=jnp.float32)
    tgts = (jax.random.uniform(k2, (B, C)) > 0.5).astype(jnp.float32)
    got = jax.block_until_ready(soft_jaccard_loss(logits, tgts))
    want = _reference(logits, tgts)
    assert jnp.allclose(got, want, atol=1e-5, rtol=1e-5), (got, want)

    # Case 2: bf16 inputs with multiple batch tiles AND multiple class
    # (reduction) tiles -> exercises the accumulator / multi-step path.
    B, C = 40, 300
    k1, k2, key = jax.random.split(key, 3)
    logits = jax.random.normal(k1, (B, C), dtype=jnp.float32).astype(jnp.bfloat16)
    tgts = (jax.random.uniform(k2, (B, C)) > 0.5).astype(jnp.bfloat16)
    got = jax.block_until_ready(
        soft_jaccard_loss(logits, tgts, batch_tile=16, c_tile=128))
    want = _reference(logits, tgts)
    assert jnp.allclose(got, want, atol=1e-4, rtol=1e-4), (got, want)

    print("KERNEL_OK")
</pallas_src>

<mosaic_0001>
module attributes {stable_mosaic.version = 11 : i64} {
  func.func @_soft_jaccard_kernel(%arg0: i32, %arg1: i32, %arg2: memref<16x128xf32, #tpu.memory_space<vmem>>, %arg3: memref<16x128xf32, #tpu.memory_space<vmem>>, %arg4: memref<16x1xf32, #tpu.memory_space<vmem>>, %arg5: memref<16x1xf32, #tpu.memory_space<vmem>>, %arg6: memref<16x1xf32, #tpu.memory_space<vmem>>) attributes {dimension_semantics = [#tpu.dimension_semantics<parallel>, #tpu.dimension_semantics<arbitrary>], iteration_bounds = array<i64: 1, 1>, scalar_prefetch = 0 : i64, scratch_operands = 2 : i64, tpu.core_type = #tpu.core_type<tc>, window_params = [{transform_indices = @transform_0, window_bounds = array<i64: 16, 128>}, {transform_indices = @transform_1, window_bounds = array<i64: 16, 128>}, {transform_indices = @transform_2, window_bounds = array<i64: 16, 1>}]} {
    %c0_i32 = arith.constant 0 : i32
    %0 = arith.cmpi eq, %arg1, %c0_i32 : i32
    %1 = arith.extui %0 : i1 to i32
    %c0_i32_0 = arith.constant 0 : i32
    %2 = arith.cmpi ne, %1, %c0_i32_0 : i32
    scf.if %2 {
      %cst_17 = arith.constant 0.000000e+00 : f32
      %28 = vector.broadcast %cst_17 : f32 to vector<16x1xf32>
      %c0_18 = arith.constant 0 : index
      %c0_19 = arith.constant 0 : index
      %29 = vector.load %arg5[%c0_18, %c0_19] : memref<16x1xf32, #tpu.memory_space<vmem>>, vector<16x1xf32>
      tpu.vector_store %arg5[%c0_18, %c0_19], %28 {strides = array<i32>} : memref<16x1xf32, #tpu.memory_space<vmem>>, vector<16x1xf32>,
      %cst_20 = arith.constant 0.000000e+00 : f32
      %30 = vector.broadcast %cst_20 : f32 to vector<16x1xf32>
      %c0_21 = arith.constant 0 : index
      %c0_22 = arith.constant 0 : index
      %31 = vector.load %arg6[%c0_21, %c0_22] : memref<16x1xf32, #tpu.memory_space<vmem>>, vector<16x1xf32>
      tpu.vector_store %arg6[%c0_21, %c0_22], %30 {strides = array<i32>} : memref<16x1xf32, #tpu.memory_space<vmem>>, vector<16x1xf32>,
    } else {
    }
    %c0 = arith.constant 0 : index
    %c0_1 = arith.constant 0 : index
    %3 = vector.load %arg2[%c0, %c0_1] : memref<16x128xf32, #tpu.memory_space<vmem>>, vector<16x128xf32>
    %c0_2 = arith.constant 0 : index
    %c0_3 = arith.constant 0 : index
    %4 = vector.load %arg3[%c0_2, %c0_3] : memref<16x128xf32, #tpu.memory_space<vmem>>, vector<16x128xf32>
    %5 = arith.negf %3 : vector<16x128xf32>
    %6 = math.exp %5 : vector<16x128xf32>
    %cst = arith.constant 1.000000e+00 : f32
    %7 = vector.broadcast %cst : f32 to vector<16x128xf32>
    %8 = arith.addf %7, %6 : vector<16x128xf32>
    %9 = arith.divf %7, %8 : vector<16x128xf32>
    %10 = arith.mulf %9, %4 : vector<16x128xf32>
    %cst_4 = arith.constant dense<0.000000e+00> : vector<16xf32>
    %11 = vector.multi_reduction <add>, %10, %cst_4 [1] : vector<16x128xf32> to vector<16xf32>
    %12 = vector.shape_cast %11 : vector<16xf32> to vector<16x1xf32>
    %cst_5 = arith.constant dense<0.000000e+00> : vector<16xf32>
    %13 = vector.multi_reduction <add>, %9, %cst_5 [1] : vector<16x128xf32> to vector<16xf32>
    %14 = vector.shape_cast %13 : vector<16xf32> to vector<16x1xf32>
    %cst_6 = arith.constant dense<0.000000e+00> : vector<16xf32>
    %15 = vector.multi_reduction <add>, %4, %cst_6 [1] : vector<16x128xf32> to vector<16xf32>
    %16 = vector.shape_cast %15 : vector<16xf32> to vector<16x1xf32>
    %17 = arith.addf %14, %16 : vector<16x1xf32>
    %18 = arith.subf %17, %12 : vector<16x1xf32>
    %c0_7 = arith.constant 0 : index
    %c0_8 = arith.constant 0 : index
    %19 = vector.load %arg5[%c0_7, %c0_8] : memref<16x1xf32, #tpu.memory_space<vmem>>, vector<16x1xf32>
    %20 = arith.addf %19, %12 : vector<16x1xf32>
    %c0_9 = arith.constant 0 : index
    %c0_10 = arith.constant 0 : index
    %21 = vector.load %arg5[%c0_9, %c0_10] : memref<16x1xf32, #tpu.memory_space<vmem>>, vector<16x1xf32>
    tpu.vector_store %arg5[%c0_9, %c0_10], %20 {strides = array<i32>} : memref<16x1xf32, #tpu.memory_space<vmem>>, vector<16x1xf32>,
    %c0_11 = arith.constant 0 : index
    %c0_12 = arith.constant 0 : index
    %22 = vector.load %arg6[%c0_11, %c0_12] : memref<16x1xf32, #tpu.memory_space<vmem>>, vector<16x1xf32>
    %23 = arith.addf %22, %18 : vector<16x1xf32>
    %c0_13 = arith.constant 0 : index
    %c0_14 = arith.constant 0 : index
    %24 = vector.load %arg6[%c0_13, %c0_14] : memref<16x1xf32, #tpu.memory_space<vmem>>, vector<16x1xf32>
    tpu.vector_store %arg6[%c0_13, %c0_14], %23 {strides = array<i32>} : memref<16x1xf32, #tpu.memory_space<vmem>>, vector<16x1xf32>,
    %c0_i32_15 = arith.constant 0 : i32
    %25 = arith.cmpi eq, %arg1, %c0_i32_15 : i32
    %26 = arith.extui %25 : i1 to i32
    %c0_i32_16 = arith.constant 0 : i32
    %27 = arith.cmpi ne, %26, %c0_i32_16 : i32
    scf.if %27 {
      %c0_17 = arith.constant 0 : index
      %c0_18 = arith.constant 0 : index
      %28 = vector.load %arg5[%c0_17, %c0_18] : memref<16x1xf32, #tpu.memory_space<vmem>>, vector<16x1xf32>
      %cst_19 = arith.constant 1.000000e-07 : f32
      %29 = vector.broadcast %cst_19 : f32 to vector<16x1xf32>
      %30 = arith.addf %28, %29 : vector<16x1xf32>
      %c0_20 = arith.constant 0 : index
      %c0_21 = arith.constant 0 : index
      %31 = vector.load %arg6[%c0_20, %c0_21] : memref<16x1xf32, #tpu.memory_space<vmem>>, vector<16x1xf32>
      %cst_22 = arith.constant 1.000000e-07 : f32
      %32 = vector.broadcast %cst_22 : f32 to vector<16x1xf32>
      %33 = arith.addf %31, %32 : vector<16x1xf32>
      %34 = arith.divf %30, %33 : vector<16x1xf32>
      %cst_23 = arith.constant 1.000000e+00 : f32
      %35 = vector.broadcast %cst_23 : f32 to vector<16x1xf32>
      %36 = arith.subf %35, %34 : vector<16x1xf32>
      %c0_24 = arith.constant 0 : index
      %c0_25 = arith.constant 0 : index
      %37 = vector.load %arg4[%c0_24, %c0_25] : memref<16x1xf32, #tpu.memory_space<vmem>>, vector<16x1xf32>
      tpu.vector_store %arg4[%c0_24, %c0_25], %36 {strides = array<i32>} : memref<16x1xf32, #tpu.memory_space<vmem>>, vector<16x1xf32>,
    } else {
    }
    return
  }
  func.func @transform_0(%arg0: i32, %arg1: i32) -> (i32, i32) {
    %c0_i32 = arith.constant 0 : i32
    return %arg0, %arg1 : i32, i32
  }
  func.func @transform_1(%arg0: i32, %arg1: i32) -> (i32, i32) {
    %c0_i32 = arith.constant 0 : i32
    return %arg0, %arg1 : i32, i32
  }
  func.func @transform_2(%arg0: i32, %arg1: i32) -> (i32, i32) {
    %c0_i32 = arith.constant 0 : i32
    %c0_i32_0 = arith.constant 0 : i32
    return %arg0, %c0_i32 : i32, i32
  }
}

</mosaic_0001>

<bundles_post_ra>
// kernel: tpu_custom_call.1
= control target key start
LH: loop header
LB: loop body
LE: loop exit
PB: predicated region body
PF: predicated region fallthrough
CT: control target
= control target key end

     0   :  { %7 = vsyncpa [#allocation5], 0  ;;  %s247_s0 = inlined_call_operand.hbm [shape: f32[16,128], index: 0, kind: input, shape index: {}]   ;;  %s248_s1 = inlined_call_operand.hbm [shape: f32[16,128], index: 1, kind: input, shape index: {}]   ;;  %s249_s2 = inlined_call_operand.vmem [shape: f32[16,1], index: 2, kind: output, shape index: {}]  }
   0x1   :  { %8 = vsyncpa [#allocation7], 0  ;;  %s187_s9 = smov [#allocation4]   ;;  %s139_s13 = scalar_lea.hbm %s247_s0, 256 }
   0x2   :  { %s14_s10 = sshll.u32 %s187_s9, 4  ;;  %p140_p0 = scmp.ne.s32.totalorder %s247_s0, %s139_s13  ;;  %s15_s10 = int_to_ptr.vmem [resolvable:$true] %s14_s10 }
   0x3   :  { %p143_p1 = scmp.lt.u32.totalorder %s139_s13, %s247_s0 }
   0x5   :  { %p145_p2 = pnand %p143_p1, %p140_p0 }
   0x7   :  { %148 = shalt.err (!%p145_p2)
}
   0x8   :  { %s149_s18 = scalar_lea.vmem %s15_s10, 256  ;;  %p154_p4 = scmp.lt.s32.totalorder %s15_s10, %s15_s10 }
   0x9   :  { %p150_p3 = scmp.ne.s32.totalorder %s15_s10, %s149_s18  ;;  %p155_p5 = scmp.lt.s32.totalorder %s149_s18, %s149_s18 }
   0xb   :  { %p156_p6 = por %p155_p5, %p154_p4 }
   0xd   :  { %p157_p7 = pnand %p156_p6, %p150_p3 }
   0xf   :  { %160 = shalt.err (!%p157_p7)
}
  0x10   :  { %s188_s19 = smov 128   ;;  %s189_s20 = smov 8  }
  0x11   :  { %20 = dma.hbm_to_vmem [thread:$0]  %s247_s0, 256, %s15_s10, [#allocation5], %s188_s19, %s188_s19, %s189_s20  }
  0x12   :  { %s190_s23 = smov [#allocation6]   ;;  %s161_s27 = scalar_lea.hbm %s248_s1, 256 }
  0x13   :  { %s26_s24 = sshll.u32 %s190_s23, 4  ;;  %p162_p8 = scmp.ne.s32.totalorder %s248_s1, %s161_s27  ;;  %s27_s24 = int_to_ptr.vmem [resolvable:$true] %s26_s24 }
  0x14   :  { %p165_p9 = scmp.lt.u32.totalorder %s161_s27, %s248_s1 }
  0x16   :  { %p167_p10 = pnand %p165_p9, %p162_p8 }
  0x18   :  { %170 = shalt.err (!%p167_p10)
}
  0x19   :  { %s171_s4 = scalar_lea.vmem %s27_s24, 256  ;;  %p176_p12 = scmp.lt.s32.totalorder %s27_s24, %s27_s24 }
  0x1a   :  { %p172_p11 = scmp.ne.s32.totalorder %s27_s24, %s171_s4  ;;  %p177_p13 = scmp.lt.s32.totalorder %s171_s4, %s171_s4 }
  0x1c   :  { %p178_p0 = por %p177_p13, %p176_p12 }
  0x1e   :  { %p179_p1 = pnand %p178_p0, %p172_p11 }
  0x20   :  { %182 = shalt.err (!%p179_p1)
}
  0x21   :  { %32 = dma.hbm_to_vmem [thread:$0]  %s248_s1, 256, %s27_s24, [#allocation7], %s188_s19, %s188_s19, %s189_s20  }
  0x22   :  { %183 = dma.done.wait [#allocation5], 256  }
  0x23   :  { %184 = vsyncadd [#allocation5], 4294967040 }
  0x24   :  { %185 = dma.done.wait [#allocation7], 256  }
  0x25   :  { %186 = vsyncadd [#allocation7], 4294967040  ;;  %v50_v0 = vld [vmem:[#allocation6] sm:$0xff]  ;;  %v48_v1 = vld [vmem:[#allocation4] sm:$0xff]  ;;  %vm43_vm0 = vcmask 7168   ;;  %v191_v14 = vmov 0.0  }
  0x26   :  { %74 = vadd.xlane.f32.xlu1 %v50_v0  ;;  %v120_v2 = vmul.f32 -1.442695, %v48_v1  ;;  %v49_v3 = vld [vmem:[#allocation4 + $0x8] sm:$0xff]  ;;  %v51_v4 = vld [vmem:[#allocation6 + $0x8] sm:$0xff]  ;;  %45 = vst.msk [vmem:[#allocation2 + $0x8] sm:$0xff] %vm43_vm0, %v191_v14  ;;  %47 = vst.msk [vmem:[#allocation3 + $0x8] sm:$0xff] %vm43_vm0, %v191_v14 }
  0x27   :  { %v121_v5 = vmul.f32 -1.442695, %v49_v3  ;;  %44 = vst.msk [vmem:[#allocation2] sm:$0xff] %vm43_vm0, %v191_v14  ;;  %46 = vst.msk [vmem:[#allocation3] sm:$0xff] %vm43_vm0, %v191_v14 }
  0x28   :  { %127 = vpow2.f32 %v120_v2 }
  0x29   :  { %129 = vpow2.f32 %v121_v5 }
  0x2a   :  { %76 = vadd.xlane.f32.xlu1 %v51_v4 }
  0x2d   :  { %v83_v18 = vld [vmem:[#allocation2 + $0x8] sm:$0xff]  ;;  %v90_v23 = vld [vmem:[#allocation3 + $0x8] sm:$0xff] }
  0x2e   :  { %v82_v24 = vld [vmem:[#allocation2] sm:$0xff]  ;;  %v89_v28 = vld [vmem:[#allocation3] sm:$0xff] }
  0x32   :  { %v128_v6 = vpop.eup %127 }
  0x33   :  { %v130_v7 = vpop.eup %129  ;;  %v58_v8 = vadd.f32 1.0, %v128_v6 }
  0x34   :  { %v59_v9 = vadd.f32 1.0, %v130_v7 }
  0x35   :  { %131 = vrcp.f32 %v58_v8 }
  0x36   :  { %133 = vrcp.f32 %v59_v9 }
  0x3f   :  { %v132_v10 = vpop.eup %131 }
  0x40   :  { %v134_v11 = vpop.eup %133  ;;  %70 = vadd.xlane.f32.xlu0 %v132_v10  ;;  %v64_v13 = vmul.f32 %v132_v10, %v50_v0 }
  0x41   :  { %v65_v12 = vmul.f32 %v134_v11, %v51_v4 }
  0x43   :  { %68 = vadd.xlane.f32.xlu1 %v65_v12 }
  0x44   :  { %72 = vadd.xlane.f32.xlu0 %v134_v11 }
  0x48   :  { %66 = vadd.xlane.f32.xlu0 %v64_v13 }
  0xb3   :  { %v75_v15 = vpop.xlane.xlu1 %74 }
  0xb7   :  { %v77_v16 = vpop.xlane.xlu1 %76 }
  0xcd   :  { %v71_v17 = vpop.xlane.xlu0 %70 }
  0xce   :  { %v78_v25 = vadd.f32 %v75_v15, %v71_v17 }
  0xd0   :  { %v69_v19 = vpop.xlane.xlu1 %68 }
  0xd1   :  { %v73_v20 = vpop.xlane.xlu0 %72  ;;  %v85_v21 = vadd.f32 %v83_v18, %v69_v19 }
  0xd2   :  { %v79_v22 = vadd.f32 %v77_v16, %v73_v20 }
  0xd3   :  { %88 = vst.msk [vmem:[#allocation2 + $0x8] sm:$0xff] %vm43_vm0, %v85_v21 }
  0xd4   :  { %v81_v26 = vsub.f32 %v79_v22, %v69_v19 }
  0xd5   :  { %v67_v27 = vpop.xlane.xlu0 %66 }
  0xd6   :  { %v92_v29 = vadd.f32 %v90_v23, %v81_v26  ;;  %v80_v30 = vsub.f32 %v78_v25, %v67_v27  ;;  %v84_v31 = vadd.f32 %v82_v24, %v67_v27 }
  0xd8   :  { %94 = vst.msk [vmem:[#allocation3 + $0x8] sm:$0xff] %vm43_vm0, %v92_v29  ;;  %87 = vst.msk [vmem:[#allocation2] sm:$0xff] %vm43_vm0, %v84_v31  ;;  %v91_v32 = vadd.f32 %v89_v28, %v80_v30 }
  0xda   :  { %93 = vst.msk [vmem:[#allocation3] sm:$0xff] %vm43_vm0, %v91_v32  ;;  %v99_v37 = vld [vmem:[#allocation2 + $0x8] sm:$0xff] }
  0xdb   :  { %v101_v39 = vadd.f32 1e-07, %v99_v37 }
  0xdf   :  { %v103_v33 = vld [vmem:[#allocation3 + $0x8] sm:$0xff]  ;;  %v98_v38 = vld [vmem:[#allocation2] sm:$0xff] }
  0xe0   :  { %v105_v34 = vadd.f32 1e-07, %v103_v33  ;;  %v100_v42 = vadd.f32 1e-07, %v98_v38 }
  0xe1   :  { %v102_v35 = vld [vmem:[#allocation3] sm:$0xff] }
  0xe2   :  { %135 = vrcp.f32 %v105_v34  ;;  %v104_v36 = vadd.f32 1e-07, %v102_v35 }
  0xe4   :  { %137 = vrcp.f32 %v104_v36 }
  0xec   :  { %v136_v40 = vpop.eup %135 }
  0xed   :  { %v109_v41 = vmul.f32 %v136_v40, %v101_v39 }
  0xee   :  { %v138_v43 = vpop.eup %137 }
  0xef   :  { %v111_v44 = vsub.f32 1.0, %v109_v41  ;;  %v107_v45 = vmul.f32 %v138_v43, %v100_v42 }
  0xf1   :  { %113 = vst.msk [vmem:[%s249_s2 + $0x8] sm:$0xff] %vm43_vm0, %v111_v44  ;;  %v110_v46 = vsub.f32 1.0, %v107_v45 }
  0xf3   :  { %112 = vst.msk [vmem:[%s249_s2] sm:$0xff] %vm43_vm0, %v110_v46 }
  0xf4   :  { %118 = vsyncpa [#allocation5], 1 }
  0xf5   :  { %119 = vsyncpa [#allocation7], 1 }

</bundles_post_ra>
